<compile_context>
chip_gen: v7x
topology: tpu7x:2x2x1
jax: 0.10.0
libtpu: 0.0.40
codegen_flags: <defaults>
</compile_context>

<pallas_src>
from typing import NamedTuple

import numpy as np
import jax
import jax.numpy as jnp
from jax.experimental import pallas as pl
from jax.experimental.pallas import tpu as pltpu


class CALAMeta(NamedTuple):
    i_nc: int
    o_nc: int
    o_g: int
    T_in: int
    T_conv: int
    T_g: int
    pool: bool
    XW: int    # flat x width  (= i_nc * T_in)
    W: int     # common lane-dense width (multiple of 128)
    YW0: int   # true l_feat flat width (= T_conv * o_nc)
    GW0: int   # true g_feat flat width (= T_g * o_g)
    R: int     # packed-weights rows
    r_wt: int  # row offset of gconv Toeplitz
    r_P: int   # row offset of per-channel-sum matrix
    r_tw: int  # row offset of tgconv Toeplitz
    r_pm: int  # row offset of param rows (gamma / beta / tgconv bias, pre-broadcast)


def _rup(n, m):
    return ((n + m - 1) // m) * m


def prepack_cala(gconv_w, bn_gamma, bn_beta, tgconv_w, tgconv_b, *, L, T_in, pool):
    """One-time packing of all CALABlock weights into a single lane-dense slab."""
    gw = np.asarray(gconv_w, np.float32)      # (o_nc, i_nc//L, K)
    gamma = np.asarray(bn_gamma, np.float32)
    beta = np.asarray(bn_beta, np.float32)
    twp = np.asarray(tgconv_w, np.float32)    # (o_g, o_nc, T_kernel)
    tbp = np.asarray(tgconv_b, np.float32)

    o_nc, cpg_in, K = gw.shape
    i_nc = cpg_in * L
    opg = o_nc // L
    o_g, o_nc2, T_kernel = twp.shape
    assert o_nc2 == o_nc and K % 2 == 1
    PAD = (K - 1) // 2
    if pool:
        assert T_in % 2 == 0
    T_conv = T_in // 2 if pool else T_in
    T_g = T_conv - T_kernel + 1
    assert T_g >= 1

    XW = i_nc * T_in
    YW0 = T_conv * o_nc
    GW0 = T_g * o_g
    W = max(128, _rup(max(YW0, GW0), 128))

    # channel_shuffle permutation: shuffled channel c' reads gconv channel order[c'].
    order = np.array([(c % L) * opg + (c // L) for c in range(o_nc)])

    # Dense (shuffled) grouped-conv weight Wd[c', i, k].
    Wd = np.zeros((o_nc, i_nc, K), np.float32)
    for cp in range(o_nc):
        c = int(order[cp])
        g = c // opg
        Wd[cp, g * cpg_in:(g + 1) * cpg_in, :] = gw[c]

    # Grouped conv + 'same' pad + shuffle as one Toeplitz:
    # row = flat pooled-x position i*T_in + stride*t ; col = t'*o_nc + c'.
    stride = 2 if pool else 1
    wtoep = np.zeros((XW, W), np.float32)
    for tp in range(T_conv):
        for k in range(K):
            t = tp + k - PAD
            if 0 <= t < T_conv:
                for i in range(i_nc):
                    wtoep[i * T_in + stride * t, tp * o_nc:(tp + 1) * o_nc] = Wd[:, i, k]

    # Per-channel sum/broadcast matrix: P[j, j'] = 1 iff channel(j) == channel(j').
    P = np.zeros((W, W), np.float32)
    ch = np.arange(YW0) % o_nc
    P[:YW0, :YW0] = (ch[:, None] == ch[None, :]).astype(np.float32)

    # BN gamma/beta: shuffled then pre-broadcast to the flat lf layout.
    gammab = np.zeros((W,), np.float32)
    betab = np.zeros((W,), np.float32)
    gammab[:YW0] = np.tile(gamma[order], T_conv)
    betab[:YW0] = np.tile(beta[order], T_conv)

    # tgconv as a Toeplitz: lf_flat -> g_flat.  row = t*o_nc + c ; col = t'*o_g + o.
    twtoep = np.zeros((W, W), np.float32)
    for tp in range(T_g):
        for k in range(T_kernel):
            t = tp + k
            twtoep[t * o_nc:(t + 1) * o_nc, tp * o_g:(tp + 1) * o_g] = twp[:, :, k].T
    tbfull = np.zeros((W,), np.float32)
    tbfull[:GW0] = np.tile(tbp, T_g)

    # Pack everything into one (R, W) slab -> a single input DMA.
    r_wt = 0
    r_P = _rup(r_wt + XW, 8)
    r_tw = _rup(r_P + W, 8)
    r_pm = _rup(r_tw + W, 8)
    R = r_pm + 8
    wpack = np.zeros((R, W), np.float32)
    wpack[r_wt:r_wt + XW, :] = wtoep
    wpack[r_P:r_P + W, :] = P
    wpack[r_tw:r_tw + W, :] = twtoep
    wpack[r_pm + 0, :] = gammab
    wpack[r_pm + 1, :] = betab
    wpack[r_pm + 2, :] = tbfull

    meta = CALAMeta(i_nc=i_nc, o_nc=o_nc, o_g=o_g, T_in=T_in, T_conv=T_conv,
                    T_g=T_g, pool=bool(pool), XW=XW, W=W, YW0=YW0, GW0=GW0,
                    R=R, r_wt=r_wt, r_P=r_P, r_tw=r_tw, r_pm=r_pm)
    return jnp.asarray(wpack), meta


def _make_kernel(B, meta):
    XW, W = meta.XW, meta.W
    r_wt, r_P, r_tw, r_pm = meta.r_wt, meta.r_P, meta.r_tw, meta.r_pm
    inv_n = 1.0 / float(B * meta.T_conv)
    eps = 1e-5
    pool = meta.pool

    def kernel(xf_ref, wp_ref, out_ref):
        xf = xf_ref[...]                                            # (B, XW)
        if pool:
            # adaptive_max_pool1d(x, T//2): pairwise max; valid results land on the
            # even flat positions, odd positions are ignored (zero Toeplitz rows).
            xs = jnp.concatenate([xf[:, 1:], xf[:, :1]], axis=1)
            xf = jnp.maximum(xf, xs)

        # Grouped conv ('same' pad) + channel shuffle: one Toeplitz MXU dot.
        y = jnp.dot(xf, wp_ref[r_wt:r_wt + XW, :],
                    preferred_element_type=jnp.float32)             # (B, W)

        # BatchNorm (train mode): per-channel sums via one MXU dot, already in
        # broadcast form over the flat lane layout.
        ssum = jnp.sum(y, axis=0, keepdims=True)                    # (1, W)
        s2sum = jnp.sum(y * y, axis=0, keepdims=True)               # (1, W)
        st = jnp.dot(jnp.concatenate([ssum, s2sum], axis=0),
                     wp_ref[r_P:r_P + W, :],
                     preferred_element_type=jnp.float32)            # (2, W)
        meanb = st[0:1, :] * inv_n
        varb = jnp.maximum(st[1:2, :] * inv_n - meanb * meanb, 0.0)  # cancellation-safe

        aux = wp_ref[r_pm:r_pm + 8, :]                  # gammab / betab / tgconv bias
        scaleb = aux[0:1, :] * jax.lax.rsqrt(varb + eps)
        shiftb = aux[1:2, :] - meanb * scaleb
        lf = jnp.maximum(y * scaleb + shiftb, 0.0)      # shuffled BN + ReLU, (B, W)
        out_ref[:, 0:W] = lf                            # lane-dense, 128-aligned store

        # tgconv (all output positions) via one Toeplitz MXU dot, + bias + ReLU.
        g = jnp.dot(lf, wp_ref[r_tw:r_tw + W, :],
                    preferred_element_type=jnp.float32) + aux[2:3, :]
        out_ref[:, W:2 * W] = jnp.maximum(g, 0.0)       # zero-padded to 128 lanes

    return kernel


def make_cala_forward(meta):
    """Returns a jittable forward(x, wpack) -> (l_feat, g_feat)."""

    def forward(x, wpack):
        B = x.shape[0]
        kernel = _make_kernel(B, meta)
        xf = x.reshape(B, meta.XW).astype(jnp.float32)  # contiguous reshape (no copy)
        out = pl.pallas_call(
            kernel,
            out_shape=jax.ShapeDtypeStruct((B, 2 * meta.W), jnp.float32),
            grid=(1,),
            in_specs=[pl.BlockSpec((B, meta.XW), lambda i: (0, 0)),
                      pl.BlockSpec((meta.R, meta.W), lambda i: (0, 0))],
            out_specs=pl.BlockSpec((B, 2 * meta.W), lambda i: (0, 0)),
            compiler_params=pltpu.CompilerParams(
                dimension_semantics=("arbitrary",)),
        )(xf, wpack)
        # Un-flatten to the module's (B, C, T) layout.  Consumers that accept the
        # flat lane-dense layout can skip these two transposes entirely.
        lf = out[:, :meta.YW0].reshape(B, meta.T_conv, meta.o_nc).transpose(0, 2, 1)
        gf = out[:, meta.W:meta.W + meta.GW0].reshape(B, meta.T_g, meta.o_g).transpose(0, 2, 1)
        return lf, gf

    return forward


def reference(x, gconv_w, bn_gamma, bn_beta, tgconv_w, tgconv_b, *, L, pool):
    """Pure-JAX reference replicating the PyTorch forward (train-mode BN)."""
    B, i_nc, t = x.shape
    K = gconv_w.shape[2]
    PAD = (K - 1) // 2
    if pool:
        x = jnp.max(x.reshape(B, i_nc, t // 2, 2), axis=-1)
    y = jax.lax.conv_general_dilated(
        x, gconv_w, window_strides=(1,), padding=((PAD, PAD),),
        dimension_numbers=('NCH', 'OIH', 'NCH'), feature_group_count=L)
    mean = jnp.mean(y, axis=(0, 2), keepdims=True)
    var = jnp.mean((y - mean) ** 2, axis=(0, 2), keepdims=True)
    y = (y - mean) * jax.lax.rsqrt(var + 1e-5)
    y = y * bn_gamma[None, :, None] + bn_beta[None, :, None]
    y = jnp.maximum(y, 0.0)
    o_nc = y.shape[1]
    cpg = o_nc // L
    l_feat = y.reshape(B, L, cpg, -1).transpose(0, 2, 1, 3).reshape(B, o_nc, -1)
    g = jax.lax.conv_general_dilated(
        l_feat, tgconv_w, window_strides=(1,), padding=((0, 0),),
        dimension_numbers=('NCH', 'OIH', 'NCH'))
    g = jnp.maximum(g + tgconv_b[None, :, None], 0.0)
    return l_feat, g


if __name__ == "__main__":
    key = jax.random.PRNGKey(0)
    # Module hyper-params: i_nc=8, o_nc=16, L=4, T=8 (tgconv kernel), pool=True
    B, i_nc, o_nc, L, T_in = 2, 8, 16, 4, 16
    pool = True
    T_kernel = (T_in // 2) if pool else T_in

    ks = jax.random.split(key, 6)
    x = jax.random.normal(ks[0], (B, i_nc, T_in), jnp.float32)
    gconv_w = 0.2 * jax.random.normal(ks[1], (o_nc, i_nc // L, 5), jnp.float32)
    bn_gamma = 1.0 + 0.1 * jax.random.normal(ks[2], (o_nc,), jnp.float32)
    bn_beta = 0.1 * jax.random.normal(ks[3], (o_nc,), jnp.float32)
    tgconv_w = 0.1 * jax.random.normal(ks[4], (o_nc // L, o_nc, T_kernel), jnp.float32)
    tgconv_b = 0.1 * jax.random.normal(ks[5], (o_nc // L,), jnp.float32)

    # One-time weight prepack (hoisted out of the hot path).
    wpack, meta = prepack_cala(gconv_w, bn_gamma, bn_beta, tgconv_w, tgconv_b,
                               L=L, T_in=T_in, pool=pool)
    forward = jax.jit(make_cala_forward(meta))

    l_feat, g_feat = forward(x, wpack)
    jax.block_until_ready((l_feat, g_feat))

    l_ref, g_ref = reference(x, gconv_w, bn_gamma, bn_beta, tgconv_w, tgconv_b,
                             L=L, pool=pool)
    assert l_feat.shape == (B, o_nc, T_in // 2) and g_feat.shape == (B, o_nc // L, 1)
    assert jnp.allclose(l_feat, l_ref, atol=1e-4, rtol=1e-4), "l_feat mismatch"
    assert jnp.allclose(g_feat, g_ref, atol=1e-4, rtol=1e-4), "g_feat mismatch"
    print("KERNEL_OK")
</pallas_src>

<mosaic_0001>
module attributes {stable_mosaic.version = 11 : i64} {
  func.func @kernel(%arg0: i32, %arg1: memref<2x128xf32, #tpu.memory_space<vmem>>, %arg2: memref<392x128xf32, #tpu.memory_space<vmem>>, %arg3: memref<2x256xf32, #tpu.memory_space<vmem>>) attributes {dimension_semantics = [#tpu.dimension_semantics<arbitrary>], iteration_bounds = array<i64: 1>, scalar_prefetch = 0 : i64, scratch_operands = 0 : i64, tpu.core_type = #tpu.core_type<tc>, window_params = [{pipeline_mode = #tpu.pipeline_mode<synchronous>, transform_indices = @transform_0, window_bounds = array<i64: 2, 128>}, {pipeline_mode = #tpu.pipeline_mode<synchronous>, transform_indices = @transform_1, window_bounds = array<i64: 392, 128>}, {pipeline_mode = #tpu.pipeline_mode<synchronous>, transform_indices = @transform_2, window_bounds = array<i64: 2, 256>}]} {
    %c0 = arith.constant 0 : index
    %c0_0 = arith.constant 0 : index
    %0 = vector.load %arg1[%c0, %c0_0] : memref<2x128xf32, #tpu.memory_space<vmem>>, vector<2x128xf32>
    %1 = vector.extract_strided_slice %0 {offsets = [0, 1], sizes = [2, 127], strides = [1, 1]} : vector<2x128xf32> to vector<2x127xf32>
    %2 = vector.extract_strided_slice %0 {offsets = [0, 0], sizes = [2, 1], strides = [1, 1]} : vector<2x128xf32> to vector<2x1xf32>
    %3 = tpu.concatenate %1, %2 in 1 : vector<2x127xf32>, vector<2x1xf32> -> vector<2x128xf32>
    %4 = arith.maximumf %0, %3 : vector<2x128xf32>
    %c0_1 = arith.constant 0 : index
    %c0_2 = arith.constant 0 : index
    %5 = vector.load %arg2[%c0_1, %c0_2] : memref<392x128xf32, #tpu.memory_space<vmem>>, vector<128x128xf32>
    %cst = arith.constant dense<0.000000e+00> : vector<2x128xf32>
    %6 = tpu.matmul %4, %5, %cst {dimension_numbers = #tpu.dot_dimension_numbers<[1], [0], [0], [1], [0, 0, 1, 1], [], []>} : vector<2x128xf32>, vector<128x128xf32>, vector<2x128xf32> -> vector<2x128xf32>
    %cst_3 = arith.constant dense<0.000000e+00> : vector<128xf32>
    %7 = vector.multi_reduction <add>, %6, %cst_3 [0] : vector<2x128xf32> to vector<128xf32>
    %8 = vector.shape_cast %7 : vector<128xf32> to vector<1x128xf32>
    %9 = arith.mulf %6, %6 : vector<2x128xf32>
    %cst_4 = arith.constant dense<0.000000e+00> : vector<128xf32>
    %10 = vector.multi_reduction <add>, %9, %cst_4 [0] : vector<2x128xf32> to vector<128xf32>
    %11 = vector.shape_cast %10 : vector<128xf32> to vector<1x128xf32>
    %12 = tpu.concatenate %8, %11 in 0 : vector<1x128xf32>, vector<1x128xf32> -> vector<2x128xf32>
    %c128 = arith.constant 128 : index
    %c0_5 = arith.constant 0 : index
    %13 = vector.load %arg2[%c128, %c0_5] : memref<392x128xf32, #tpu.memory_space<vmem>>, vector<128x128xf32>
    %cst_6 = arith.constant dense<0.000000e+00> : vector<2x128xf32>
    %14 = tpu.matmul %12, %13, %cst_6 {dimension_numbers = #tpu.dot_dimension_numbers<[1], [0], [0], [1], [0, 0, 1, 1], [], []>} : vector<2x128xf32>, vector<128x128xf32>, vector<2x128xf32> -> vector<2x128xf32>
    %15 = vector.extract_strided_slice %14 {offsets = [0, 0], sizes = [1, 128], strides = [1, 1]} : vector<2x128xf32> to vector<1x128xf32>
    %cst_7 = arith.constant 6.250000e-02 : f32
    %16 = vector.broadcast %cst_7 : f32 to vector<1x128xf32>
    %17 = arith.mulf %15, %16 : vector<1x128xf32>
    %18 = vector.extract_strided_slice %14 {offsets = [1, 0], sizes = [1, 128], strides = [1, 1]} : vector<2x128xf32> to vector<1x128xf32>
    %cst_8 = arith.constant 6.250000e-02 : f32
    %19 = vector.broadcast %cst_8 : f32 to vector<1x128xf32>
    %20 = arith.mulf %18, %19 : vector<1x128xf32>
    %21 = arith.mulf %17, %17 : vector<1x128xf32>
    %22 = arith.subf %20, %21 : vector<1x128xf32>
    %cst_9 = arith.constant 0.000000e+00 : f32
    %23 = vector.broadcast %cst_9 : f32 to vector<1x128xf32>
    %24 = arith.maximumf %22, %23 : vector<1x128xf32>
    %c384 = arith.constant 384 : index
    %c0_10 = arith.constant 0 : index
    %25 = vector.load %arg2[%c384, %c0_10] : memref<392x128xf32, #tpu.memory_space<vmem>>, vector<8x128xf32>
    %26 = vector.extract_strided_slice %25 {offsets = [0, 0], sizes = [1, 128], strides = [1, 1]} : vector<8x128xf32> to vector<1x128xf32>
    %cst_11 = arith.constant 9.99999974E-6 : f32
    %27 = vector.broadcast %cst_11 : f32 to vector<1x128xf32>
    %28 = arith.addf %24, %27 : vector<1x128xf32>
    %29 = math.rsqrt %28 : vector<1x128xf32>
    %30 = arith.mulf %26, %29 : vector<1x128xf32>
    %31 = vector.extract_strided_slice %25 {offsets = [1, 0], sizes = [1, 128], strides = [1, 1]} : vector<8x128xf32> to vector<1x128xf32>
    %32 = arith.mulf %17, %30 : vector<1x128xf32>
    %33 = arith.subf %31, %32 : vector<1x128xf32>
    %34 = vector.broadcast %30 : vector<1x128xf32> to vector<2x128xf32>
    %35 = arith.mulf %6, %34 : vector<2x128xf32>
    %36 = vector.broadcast %33 : vector<1x128xf32> to vector<2x128xf32>
    %37 = arith.addf %35, %36 : vector<2x128xf32>
    %cst_12 = arith.constant 0.000000e+00 : f32
    %38 = vector.broadcast %cst_12 : f32 to vector<2x128xf32>
    %39 = arith.maximumf %37, %38 : vector<2x128xf32>
    %c0_13 = arith.constant 0 : index
    %c0_14 = arith.constant 0 : index
    %40 = vector.load %arg3[%c0_13, %c0_14] : memref<2x256xf32, #tpu.memory_space<vmem>>, vector<2x128xf32>
    tpu.vector_store %arg3[%c0_13, %c0_14], %39 {strides = array<i32>} : memref<2x256xf32, #tpu.memory_space<vmem>>, vector<2x128xf32>,
    %c256 = arith.constant 256 : index
    %c0_15 = arith.constant 0 : index
    %41 = vector.load %arg2[%c256, %c0_15] : memref<392x128xf32, #tpu.memory_space<vmem>>, vector<128x128xf32>
    %cst_16 = arith.constant dense<0.000000e+00> : vector<2x128xf32>
    %42 = tpu.matmul %39, %41, %cst_16 {dimension_numbers = #tpu.dot_dimension_numbers<[1], [0], [0], [1], [0, 0, 1, 1], [], []>} : vector<2x128xf32>, vector<128x128xf32>, vector<2x128xf32> -> vector<2x128xf32>
    %43 = vector.extract_strided_slice %25 {offsets = [2, 0], sizes = [1, 128], strides = [1, 1]} : vector<8x128xf32> to vector<1x128xf32>
    %44 = vector.broadcast %43 : vector<1x128xf32> to vector<2x128xf32>
    %45 = arith.addf %42, %44 : vector<2x128xf32>
    %cst_17 = arith.constant 0.000000e+00 : f32
    %46 = vector.broadcast %cst_17 : f32 to vector<2x128xf32>
    %47 = arith.maximumf %45, %46 : vector<2x128xf32>
    %c0_18 = arith.constant 0 : index
    %c128_19 = arith.constant 128 : index
    %48 = vector.load %arg3[%c0_18, %c128_19] : memref<2x256xf32, #tpu.memory_space<vmem>>, vector<2x128xf32>
    tpu.vector_store %arg3[%c0_18, %c128_19], %47 {strides = array<i32>} : memref<2x256xf32, #tpu.memory_space<vmem>>, vector<2x128xf32>,
    return
  }
  func.func @transform_0(%arg0: i32) -> (i32, i32) {
    %c0_i32 = arith.constant 0 : i32
    %c0_i32_0 = arith.constant 0 : i32
    %c0_i32_1 = arith.constant 0 : i32
    return %c0_i32, %c0_i32_0 : i32, i32
  }
  func.func @transform_1(%arg0: i32) -> (i32, i32) {
    %c0_i32 = arith.constant 0 : i32
    %c0_i32_0 = arith.constant 0 : i32
    %c0_i32_1 = arith.constant 0 : i32
    return %c0_i32, %c0_i32_0 : i32, i32
  }
  func.func @transform_2(%arg0: i32) -> (i32, i32) {
    %c0_i32 = arith.constant 0 : i32
    %c0_i32_0 = arith.constant 0 : i32
    %c0_i32_1 = arith.constant 0 : i32
    return %c0_i32, %c0_i32_0 : i32, i32
  }
}

</mosaic_0001>

<bundles_post_ra>
// kernel: forward.1
= control target key start
LH: loop header
LB: loop body
LE: loop exit
PB: predicated region body
PF: predicated region fallthrough
CT: control target
= control target key end

     0   :  { %7 = vsyncpa [#allocation3], 0  ;;  %s610_s9 = smov [#allocation2]   ;;  %s693_s0 = inlined_call_operand.vmem [shape: f32[2,128], index: 0, kind: input, shape index: {}]   ;;  %s694_s1 = inlined_call_operand.hbm [shape: f32[392,128], index: 1, kind: input, shape index: {}]   ;;  %s695_s2 = inlined_call_operand.vmem [shape: f32[2,256], index: 2, kind: output, shape index: {}]  }
   0x1   :  { %s15_s10 = sshll.u32 %s610_s9, 4  ;;  %s586_s13 = scalar_lea.hbm %s694_s1, 6272  ;;  %s16_s10 = int_to_ptr.vmem [resolvable:$true] %s15_s10 }
   0x2   :  { %p587_p0 = scmp.ne.s32.totalorder %s694_s1, %s586_s13  ;;  %p590_p1 = scmp.lt.u32.totalorder %s586_s13, %s694_s1 }
   0x4   :  { %p592_p2 = pnand %p590_p1, %p587_p0 }
   0x6   :  { %595 = shalt.err (!%p592_p2)
}
   0x7   :  { %s596_s18 = scalar_lea.vmem %s16_s10, 6272  ;;  %p601_p4 = scmp.lt.s32.totalorder %s16_s10, %s16_s10 }
   0x8   :  { %p597_p3 = scmp.ne.s32.totalorder %s16_s10, %s596_s18  ;;  %p602_p5 = scmp.lt.s32.totalorder %s596_s18, %s596_s18 }
   0xa   :  { %p603_p6 = por %p602_p5, %p601_p4 }
   0xc   :  { %p604_p7 = pnand %p603_p6, %p597_p3 }
   0xe   :  { %607 = shalt.err (!%p604_p7)
}
   0xf   :  { %s611_s19 = smov 128   ;;  %s612_s20 = smov 8  }
  0x10   :  { %21 = dma.hbm_to_vmem [thread:$0]  %s694_s1, 6272, %s16_s10, [#allocation3], %s611_s19, %s611_s19, %s612_s20  }
  0x11   :  { %608 = dma.done.wait [#allocation3], 6272  }
  0x12   :  { %609 = vsyncadd [#allocation3], 4294961024  ;;  %v613_v0 = vmov 0.0|0.0   ;;  %vm614_vm0 = vmmov 0   ;;  %v615_v1 = vmov 0.0   ;;  %v31_v3 = vld [vmem:[#allocation2] sm:$0xff] }
  0x13   :  { %505 = vmatprep.subr.bf16.mxu0 %v613_v0  ;;  %432 = vmatprep.mubr.msk.f32.mxu0 %vm614_vm0, %v615_v1  ;;  %v653_v2 = vld [vmem:[%s693_s0] sm:$0x3]  ;;  %v32_v4 = vld [vmem:[#allocation2 + $0x8] sm:$0xff]  ;;  %s616_s1 = smov 127   ;;  %v33_v6 = vld [vmem:[#allocation2 + $0x10] sm:$0xff]  ;;  %vm117_vm1 = vcmask 1041408  }
  0x14   :  { %529 = vmatprep.subr.bf16.mxu1 %v613_v0  ;;  %467 = vmatprep.mubr.msk.f32.mxu1 %vm614_vm0, %v615_v1  ;;  %v506_v5 = vpack.c.bf16 %v32_v4, %v31_v3  ;;  %v34_v7 = vld [vmem:[#allocation2 + $0x18] sm:$0xff]  ;;  %v35_v9 = vld [vmem:[#allocation2 + $0x20] sm:$0xff]  ;;  %v36_v10 = vld [vmem:[#allocation2 + $0x28] sm:$0xff]  ;;  %vm133_vm2 = vcmask 1040384  }
  0x15   :  { %27 = vrot.lane.b32.xlu0 %v653_v2, %s616_s1  ;;  %v509_v8 = vpack.c.bf16 %v34_v7, %v33_v6  ;;  %v135_v11 = vld [vmem:[#allocation2 + $0x80] sm:$0xff]  ;;  %v136_v12 = vld [vmem:[#allocation2 + $0x88] sm:$0xff]  ;;  %v137_v13 = vld [vmem:[#allocation2 + $0x90] sm:$0xff]  ;;  %v512_v15 = vpack.c.bf16 %v36_v10, %v35_v9 }
  0x16   :  { %507 = vmatpush3.bf16.msra.mxu0 %v506_v5  ;;  %v138_v14 = vld [vmem:[#allocation2 + $0x98] sm:$0xff]  ;;  %v530_v16 = vpack.c.bf16 %v136_v12, %v135_v11  ;;  %v37_v17 = vld [vmem:[#allocation2 + $0x30] sm:$0xff]  ;;  %v139_v20 = vld [vmem:[#allocation2 + $0xa0] sm:$0xff] }
  0x17   :  { %508 = vmatprep.subr.bf16.mxu0 %v613_v0  ;;  %v38_v18 = vld [vmem:[#allocation2 + $0x38] sm:$0xff]  ;;  %v533_v19 = vpack.c.bf16 %v138_v14, %v137_v13  ;;  %v140_v21 = vld [vmem:[#allocation2 + $0xa8] sm:$0xff]  ;;  %v39_v23 = vld [vmem:[#allocation2 + $0x40] sm:$0xff] }
  0x18   :  { %531 = vmatpush3.bf16.msra.mxu1 %v530_v16  ;;  %v515_v22 = vpack.c.bf16 %v38_v18, %v37_v17  ;;  %v40_v24 = vld [vmem:[#allocation2 + $0x48] sm:$0xff]  ;;  %v536_v25 = vpack.c.bf16 %v140_v21, %v139_v20  ;;  %v141_v26 = vld [vmem:[#allocation2 + $0xb0] sm:$0xff]  ;;  %v142_v27 = vld [vmem:[#allocation2 + $0xb8] sm:$0xff] }
  0x19   :  { %532 = vmatprep.subr.bf16.mxu1 %v613_v0  ;;  %v518_v28 = vpack.c.bf16 %v40_v24, %v39_v23  ;;  %v41_v29 = vld [vmem:[#allocation2 + $0x50] sm:$0xff]  ;;  %v42_v30 = vld [vmem:[#allocation2 + $0x58] sm:$0xff]  ;;  %v539_v31 = vpack.c.bf16 %v142_v27, %v141_v26  ;;  %v43_v33 = vld [vmem:[#allocation2 + $0x60] sm:$0xff] }
  0x1a   :  { %510 = vmatpush3.bf16.msra.mxu0 %v509_v8  ;;  %v521_v32 = vpack.c.bf16 %v42_v30, %v41_v29  ;;  %v44_v34 = vld [vmem:[#allocation2 + $0x68] sm:$0xff]  ;;  %v45_v36 = vld [vmem:[#allocation2 + $0x70] sm:$0xff]  ;;  %v46_v37 = vld [vmem:[#allocation2 + $0x78] sm:$0xff] }
  0x1b   :  { %511 = vmatprep.subr.bf16.mxu0 %v613_v0  ;;  %v524_v35 = vpack.c.bf16 %v44_v34, %v43_v33  ;;  %v527_v38 = vpack.c.bf16 %v46_v37, %v45_v36  ;;  %v143_v41 = vld [vmem:[#allocation2 + $0xc0] sm:$0xff]  ;;  %v144_v42 = vld [vmem:[#allocation2 + $0xc8] sm:$0xff]  ;;  %v145_v44 = vld [vmem:[#allocation2 + $0xd0] sm:$0xff] }
  0x1c   :  { %534 = vmatpush3.bf16.msra.mxu1 %v533_v19  ;;  %v542_v43 = vpack.c.bf16 %v144_v42, %v143_v41  ;;  %v146_v45 = vld [vmem:[#allocation2 + $0xd8] sm:$0xff]  ;;  %v147_v47 = vld [vmem:[#allocation2 + $0xe0] sm:$0xff]  ;;  %v148_v48 = vld [vmem:[#allocation2 + $0xe8] sm:$0xff] }
  0x1d   :  { %535 = vmatprep.subr.bf16.mxu1 %v613_v0  ;;  %v545_v46 = vpack.c.bf16 %v146_v45, %v145_v44  ;;  %v548_v49 = vpack.c.bf16 %v148_v48, %v147_v47  ;;  %v149_v50 = vld [vmem:[#allocation2 + $0xf0] sm:$0xff]  ;;  %v150_v51 = vld [vmem:[#allocation2 + $0xf8] sm:$0xff]  ;;  %v252_v8 = vld [vmem:[#allocation2 + $0x100] sm:$0xff] }
  0x1e   :  { %513 = vmatpush3.bf16.msra.mxu0 %v512_v15  ;;  %v551_v52 = vpack.c.bf16 %v150_v51, %v149_v50  ;;  %v253_v9 = vld [vmem:[#allocation2 + $0x108] sm:$0xff]  ;;  %v254_v11 = vld [vmem:[#allocation2 + $0x110] sm:$0xff]  ;;  %v255_v12 = vld [vmem:[#allocation2 + $0x118] sm:$0xff] }
  0x1f   :  { %514 = vmatprep.subr.bf16.mxu0 %v613_v0  ;;  %v554_v10 = vpack.c.bf16 %v253_v9, %v252_v8  ;;  %v557_v13 = vpack.c.bf16 %v255_v12, %v254_v11  ;;  %v256_v14 = vld [vmem:[#allocation2 + $0x120] sm:$0xff]  ;;  %v257_v15 = vld [vmem:[#allocation2 + $0x128] sm:$0xff]  ;;  %v258_v17 = vld [vmem:[#allocation2 + $0x130] sm:$0xff] }
  0x20   :  { %537 = vmatpush3.bf16.msra.mxu1 %v536_v25  ;;  %v560_v16 = vpack.c.bf16 %v257_v15, %v256_v14  ;;  %v259_v18 = vld [vmem:[#allocation2 + $0x138] sm:$0xff]  ;;  %v260_v20 = vld [vmem:[#allocation2 + $0x140] sm:$0xff]  ;;  %v261_v21 = vld [vmem:[#allocation2 + $0x148] sm:$0xff] }
  0x21   :  { %538 = vmatprep.subr.bf16.mxu1 %v613_v0  ;;  %v563_v19 = vpack.c.bf16 %v259_v18, %v258_v17  ;;  %v262_v23 = vld [vmem:[#allocation2 + $0x150] sm:$0xff]  ;;  %v263_v24 = vld [vmem:[#allocation2 + $0x158] sm:$0xff]  ;;  %v264_v26 = vld [vmem:[#allocation2 + $0x160] sm:$0xff] }
  0x22   :  { %516 = vmatpush3.bf16.msra.mxu0 %v515_v22  ;;  %v566_v22 = vpack.c.bf16 %v261_v21, %v260_v20  ;;  %v569_v25 = vpack.c.bf16 %v263_v24, %v262_v23  ;;  %v265_v27 = vld [vmem:[#allocation2 + $0x168] sm:$0xff]  ;;  %v266_v29 = vld [vmem:[#allocation2 + $0x170] sm:$0xff]  ;;  %v267_v30 = vld [vmem:[#allocation2 + $0x178] sm:$0xff] }
  0x23   :  { %517 = vmatprep.subr.bf16.mxu0 %v613_v0 }
  0x24   :  { %540 = vmatpush3.bf16.msra.mxu1 %v539_v31  ;;  %v575_v31 = vpack.c.bf16 %v267_v30, %v266_v29 }
  0x25   :  { %541 = vmatprep.subr.bf16.mxu1 %v613_v0 }
  0x26   :  { %519 = vmatpush3.bf16.msra.mxu0 %v518_v28  ;;  %v572_v28 = vpack.c.bf16 %v265_v27, %v264_v26 }
  0x27   :  { %520 = vmatprep.subr.bf16.mxu0 %v613_v0 }
  0x28   :  { %543 = vmatpush3.bf16.msra.mxu1 %v542_v43  ;;  %v228_v43 = vld [vmem:[#allocation2 + $0x180] sm:$0xff] }
  0x29   :  { %544 = vmatprep.subr.bf16.mxu1 %v613_v0 }
  0x2a   :  { %522 = vmatpush3.bf16.msra.mxu0 %v521_v32 }
  0x2b   :  { %523 = vmatprep.subr.bf16.mxu0 %v613_v0 }
  0x2c   :  { %546 = vmatpush3.bf16.msra.mxu1 %v545_v46 }
  0x2d   :  { %547 = vmatprep.subr.bf16.mxu1 %v613_v0 }
  0x2e   :  { %525 = vmatpush3.bf16.msra.mxu0 %v524_v35 }
  0x2f   :  { %526 = vmatprep.subr.bf16.mxu0 %v613_v0 }
  0x30   :  { %549 = vmatpush3.bf16.msra.mxu1 %v548_v49 }
  0x31   :  { %550 = vmatprep.subr.bf16.mxu1 %v613_v0 }
  0x32   :  { %528 = vmatpush3.bf16.msra.mxu0 %v527_v38 }
  0x33   :  { %553 = vmatprep.subr.bf16.mxu0 %v613_v0 }
  0x34   :  { %552 = vmatpush3.bf16.msra.mxu1 %v551_v52 }
  0x87   :  { %v28_v39 = vpop.permute.xlu0 %27 }
  0x88   :  { %v30_v40 = vmax.f32 %v653_v2, %v28_v39 }
  0x8a   :  { %433 = vmatmul.mubr.f32.vlgmr.msra.gmra.mrb[0].mxu0 %v30_v40  ;;  %v240_v40 = vlaneseq }
  0x8b   :  { %502 = vmatprep.mubr.msk.f32.mxu0 %vm614_vm0, %v615_v1  ;;  %555 = vmatpush3.bf16.msra.mxu0 %v554_v10 }
  0x8c   :  { %556 = vmatprep.subr.bf16.mxu0 %v613_v0  ;;  %v241_v41 = vshrl.u32 %v240_v40, 7 }
  0x8e   :  { %v242_v45 = vsub.s32 0, %v241_v41  ;;  %v247_v49 = vsub.s32 1, %v241_v41 }
  0x8f   :  { %558 = vmatpush3.bf16.msra.mxu0 %v557_v13 }
  0x90   :  { %559 = vmatprep.subr.bf16.mxu0 %v613_v0 }
  0x93   :  { %561 = vmatpush3.bf16.msra.mxu0 %v560_v16 }
  0x94   :  { %562 = vmatprep.subr.bf16.mxu0 %v613_v0 }
  0x97   :  { %564 = vmatpush3.bf16.msra.mxu0 %v563_v19 }
  0x98   :  { %565 = vmatprep.subr.bf16.mxu0 %v613_v0 }
  0x9b   :  { %567 = vmatpush3.bf16.msra.mxu0 %v566_v22 }
  0x9c   :  { %568 = vmatprep.subr.bf16.mxu0 %v613_v0 }
  0x9f   :  { %570 = vmatpush3.bf16.msra.mxu0 %v569_v25 }
  0xa0   :  { %571 = vmatprep.subr.bf16.mxu0 %v613_v0 }
  0xa3   :  { %573 = vmatpush3.bf16.msra.mxu0 %v572_v28 }
  0xa4   :  { %574 = vmatprep.subr.bf16.mxu0 %v613_v0 }
  0xa7   :  { %576 = vmatpush3.bf16.msra.mxu0 %v575_v31 }
 0x15d   :  { %v674_v53 = vpop.f32.mrb[0].mxu0 }
 0x15e   :  { %v118_v54 = vsel %vm117_vm1, %v674_v53, 0.0  ;;  %v125_v55 = vmul.f32 %v674_v53, %v674_v53  ;;  %v434_v56 = vpop.f32.mrb[1].mxu0 }
 0x15f   :  { %v119_v57 = vrot.slane %v118_v54, 4  ;;  %v270_v56 = vsub.s32 2, %v241_v41 }
 0x160   :  { %v126_v58 = vsel %vm117_vm1, %v125_v55, 0.0 }
 0x161   :  { %v120_v59 = vadd.f32 %v119_v57, %v118_v54  ;;  %v127_v60 = vrot.slane %v126_v58, 4  ;;  %v271_v57 = vrot.slane %v228_v43, %v270_v56 }
 0x163   :  { %v121_v61 = vrot.slane %v120_v59, 2  ;;  %v128_v62 = vadd.f32 %v127_v60, %v126_v58 }
 0x165   :  { %v122_v63 = vadd.f32 %v121_v61, %v120_v59  ;;  %v129_v1 = vrot.slane %v128_v62, 2 }
 0x167   :  { %v123_v2 = vrot.slane %v122_v63, 1  ;;  %v130_v3 = vadd.f32 %v129_v1, %v128_v62 }
 0x169   :  { %v131_v4 = vrot.slane %v130_v3, 1  ;;  %v124_v5 = vadd.f32 %v123_v2, %v122_v63 }
 0x16b   :  { %v132_v6 = vadd.f32 %v131_v4, %v130_v3 }
 0x16d   :  { %v134_v7 = vsel %vm133_vm2, %v124_v5, %v132_v6 }
 0x16e   :  { %468 = vmatmul.mubr.f32.vlgmr.msra.gmra.mrb[0].mxu1 %v134_v7 }
 0x241   :  { %v217_v32 = vpop.f32.mrb[0].mxu1 }
 0x242   :  { %v221_v33 = vmul.f32 0.0625, %v217_v32  ;;  %v469_v34 = vpop.f32.mrb[1].mxu1 }
 0x244   :  { %v222_v35 = vmul.f32 %v221_v33, %v221_v33 }
 0x246   :  { %v224_v36 = vrot.slane %v222_v35, 7 }
 0x248   :  { %v226_v37 = vsub.f32 %v221_v33, %v224_v36 }
 0x24a   :  { %v227_v38 = vmax.f32 %v226_v37, 0.0 }
 0x24c   :  { %v229_v39 = vadd.f32 1e-05, %v227_v38 }
 0x24e   :  { %584 = vrsqrt.f32 %v229_v39 }
 0x258   :  { %v585_v42 = vpop.eup %584 }
 0x259   :  { %v232_v44 = vrot.slane %v585_v42, 1 }
 0x25b   :  { %v234_v0 = vmul.f32 %v232_v44, %v228_v43 }
 0x25d   :  { %v235_v46 = vmul.f32 %v234_v0, %v221_v33  ;;  %v243_v47 = vrot.slane %v234_v0, %v242_v45 }
 0x25f   :  { %v237_v48 = vrot.slane %v235_v46, 7  ;;  %v244_v50 = vmul.f32 %v243_v47, %v674_v53 }
 0x261   :  { %v239_v51 = vsub.f32 %v228_v43, %v237_v48 }
 0x263   :  { %v248_v52 = vrot.slane %v239_v51, %v247_v49 }
 0x265   :  { %v249_v54 = vadd.f32 %v248_v52, %v244_v50 }
 0x267   :  { %v250_v55 = vmax.f32 %v249_v54, 0.0 }
 0x269   :  { %251 = vst [vmem:[%s695_s2] sm:$0x3] %v250_v55  ;;  %503 = vmatmul.mubr.f32.vlgmr.msra.gmra.mrb[2].mxu0 %v250_v55 }
 0x33c   :  { %v338_v58 = vpop.f32.mrb[2].mxu0 }
 0x33d   :  { %v339_v59 = vadd.f32 %v338_v58, %v271_v57  ;;  %v504_v60 = vpop.f32.mrb[3].mxu0 }
 0x33f   :  { %v342_v61 = vmax.f32 %v339_v59, 0.0 }
 0x341   :  { %343 = vst [vmem:[%s695_s2 + $0x2] sm:$0x3] %v342_v61 }
 0x342   :  { %348 = vsyncpa [#allocation3], 1 }

</bundles_post_ra>
